<compile_context>
chip_gen: v6e
topology: v6e:2x2x1
jax: 0.10.0
libtpu: 0.0.40
codegen_flags: <defaults>
</compile_context>

<pallas_src>
import functools

import numpy as np
import jax
import jax.numpy as jnp
from jax.experimental import pallas as pl
from jax.experimental.pallas import tpu as pltpu


# ---------------------------------------------------------------------------
# Interpolation matrices / taps (numpy, trace time only - review item #9).
# ---------------------------------------------------------------------------
def _bilinear_matrix_np(in_size: int, out_size: int) -> np.ndarray:
    """(out_size, in_size) align_corners=True bilinear interpolation matrix
    (semantics of nn.UpsamplingBilinear2d)."""
    scale = (in_size - 1) / (out_size - 1) if out_size > 1 else 0.0
    m = np.zeros((out_size, in_size), np.float32)
    for o in range(out_size):
        src = o * scale
        i0 = min(max(int(np.floor(src)), 0), in_size - 1)
        i1 = min(i0 + 1, in_size - 1)
        w1 = float(src - i0)
        m[o, i0] += 1.0 - w1
        m[o, i1] += w1
    return m


def _bilinear_taps_np(in_size: int, out_size: int):
    """Static per-output-row 2-tap (i0, i1, w0, w1) list for the same resize."""
    scale = (in_size - 1) / (out_size - 1) if out_size > 1 else 0.0
    taps = []
    for o in range(out_size):
        src = o * scale
        i0 = min(max(int(np.floor(src)), 0), in_size - 1)
        i1 = min(i0 + 1, in_size - 1)
        w1 = float(src - i0)
        w0 = 1.0 - w1
        if i1 == i0:                      # boundary row: fold both taps
            w0, w1 = w0 + w1, 0.0
        taps.append((i0, i1, w0, w1))
    return tuple(taps)


# ---------------------------------------------------------------------------
# Channel-tile selection (review items #4, #5, #7).
# ---------------------------------------------------------------------------
_TC_BUDGET = 20 << 20      # per-grid-step working-set target, fits every gen


def _choose_channel_tile(nc: int, per_chan_bytes: int, budget: int):
    """Return (channel tile TC, padded channel count NCP).

    TC is always a multiple of 8 (sublane width).  Prefer (a) one block or a
    clean 2-way split for small nc, (b) a multiple-of-8 divisor of nc (no
    padding copy), (c) otherwise pad nc up to a multiple of TC instead of
    collapsing to a degenerate TC=1 grid.
    """
    budget = max(budget, 1 << 20)
    cap = max(8, (budget // max(per_chan_bytes, 1)) // 8 * 8)
    if nc <= cap:
        # split in two when it is free so both v7x TensorCores get work
        if nc >= 16 and nc % 16 == 0 and (nc // 2) <= cap:
            return nc // 2, nc
        tc = -(-nc // 8) * 8
        return tc, tc
    best = 0
    for d in range(8, cap + 1, 8):
        if nc % d == 0:
            best = d
    if best >= 8:
        return best, nc
    tc = cap
    return tc, -(-nc // tc) * tc


# ---------------------------------------------------------------------------
# Kernels.
# ---------------------------------------------------------------------------
def _flat_pyramid_kernel(num_levels, x_ref, *refs):
    """Small-spatial path: spatial dims flattened onto the lane dim.

    x_ref:  (TC, H*W)
    refs:   [M_1 (H0W0,H1W1), ..., M_L]  then  [o_1 (TC,H1W1), ..., o_L]
    where M_l = kron(Wh_l, Ww_l)^T, so each level is ONE lane-dense 2-D matmul
    and every store writes a wide (>=128 for the dominant level) lane dim.
    """
    m_refs = refs[:num_levels]
    o_refs = refs[num_levels:]

    cur = x_ref[...].astype(jnp.float32)                    # (TC, Hi*Wi), f32
    for lvl in range(num_levels):
        cur = jnp.dot(cur, m_refs[lvl][...],
                      preferred_element_type=jnp.float32)   # (TC, Ho*Wo)
        o_refs[lvl][...] = cur.astype(o_refs[lvl].dtype)


def _sep_pyramid_kernel(num_levels, sizes, taps, x_ref, *refs):
    """Large-spatial path: separable resize on (TC, H, W) channel tiles.

    x_ref:  (TC, H, W)
    refs:   [WwT_1 (W0,W1), ..., WwT_L]  then  [o_1 (TC,H1,W1), ..., o_L]
    Width pass  = one 2-D MXU matmul with free dim TC*Hi.
    Height pass = 2-tap VPU blend per output row (static taps) - no broadcast
    materialization and no batched tiny matmuls (review item #2).
    """
    ww_refs = refs[:num_levels]
    o_refs = refs[num_levels:]

    cur = x_ref[...].astype(jnp.float32)                    # (TC, Hi, Wi), f32
    tc = cur.shape[0]
    for lvl in range(num_levels):
        hi, wi = sizes[lvl]
        ho, wo = sizes[lvl + 1]
        wwt = ww_refs[lvl][...]                              # (Wi, Wo)

        # ---- width pass: single 2-D matmul; pad Hi to a sublane multiple so
        # the (TC,Hi,Wi)->(TC*Hi,Wi) merge is layout-preserving (item #10) ----
        hip = -(-hi // 8) * 8
        if hip != hi:
            cur = jnp.concatenate(
                [cur, jnp.zeros((tc, hip - hi, wi), jnp.float32)], axis=1)
        tmp = jnp.dot(cur.reshape(tc * hip, wi), wwt,
                      preferred_element_type=jnp.float32).reshape(tc, hip, wo)

        # ---- height pass: 2-tap blend, taps are trace-time constants ----
        # TODO(synk): for very large Ho this unrolls Ho slab ops; a strided-
        # slice formulation would keep codegen O(1) per level.
        rows = []
        for (i0, i1, w0, w1) in taps[lvl]:
            r = tmp[:, i0, :] * w0
            if w1 != 0.0:
                r = r + tmp[:, i1, :] * w1
            rows.append(r)
        cur = jnp.stack(rows, axis=1)                        # (TC, Ho, Wo)

        o_refs[lvl][...] = cur.astype(o_refs[lvl].dtype)


# ---------------------------------------------------------------------------
# Forward.
# ---------------------------------------------------------------------------
def _forward(x: jnp.ndarray, num_scales: int):
    n, c, h, w = x.shape
    if num_scales <= 1:
        return (x,)

    num_levels = num_scales - 1
    nc = n * c
    esz = jnp.dtype(x.dtype).itemsize

    # Per-level spatial sizes: PyTorch Upsample(scale_factor=0.5) -> floor(size/2).
    sizes = [(h, w)]
    for _ in range(num_levels):
        ph, pw = sizes[-1]
        nh, nw = ph // 2, pw // 2
        if nh < 1 or nw < 1:
            raise ValueError(
                f"num_scales={num_scales} is too deep for a {h}x{w} input")
        sizes.append((nh, nw))
    sizes = tuple(sizes)
    out_elems = sum(ho * wo for (ho, wo) in sizes[1:])

    # Choose formulation: fully-flattened (lane-dense everything) when the
    # per-level kron matrices are small; separable matmul+blend otherwise
    # (there W/2 >= 128, so the dominant level-1 stores are lane-dense anyway).
    kron_elems = sum(hi * wi * ho * wo
                     for (hi, wi), (ho, wo) in zip(sizes[:-1], sizes[1:]))
    use_flat = (kron_elems * 4) <= (2 << 20)

    if use_flat:
        weights = [jnp.asarray(np.kron(_bilinear_matrix_np(hi, ho),
                                       _bilinear_matrix_np(wi, wo)).T
                               .astype(np.float32))
                   for (hi, wi), (ho, wo) in zip(sizes[:-1], sizes[1:])]
        weight_bytes = kron_elems * 4
        per_chan = 2 * h * w * esz + 2 * out_elems * esz + 8 * h * w
        tc, ncp = _choose_channel_tile(nc, per_chan,
                                       _TC_BUDGET - 2 * weight_bytes)

        x2 = x.reshape(nc, h * w)                       # free metadata reshape
        if ncp != nc:
            x2 = jnp.pad(x2, ((0, ncp - nc), (0, 0)))

        in_specs = [pl.BlockSpec((tc, h * w), lambda i: (i, 0))]
        in_specs += [pl.BlockSpec(wm.shape, lambda i: (0, 0)) for wm in weights]
        out_specs, out_shapes = [], []
        for (ho, wo) in sizes[1:]:
            out_specs.append(pl.BlockSpec((tc, ho * wo), lambda i: (i, 0)))
            out_shapes.append(jax.ShapeDtypeStruct((ncp, ho * wo), x.dtype))

        flops = 2 * ncp * kron_elems
        bytes_accessed = ncp * (h * w + out_elems) * esz + weight_bytes
        kernel = functools.partial(_flat_pyramid_kernel, num_levels)
        operands = (x2, *weights)
    else:
        wwts = [jnp.asarray(_bilinear_matrix_np(wi, wo).T)
                for (_, wi), (_, wo) in zip(sizes[:-1], sizes[1:])]
        taps = tuple(_bilinear_taps_np(hi, ho)
                     for (hi, _), (ho, _) in zip(sizes[:-1], sizes[1:]))
        weight_bytes = sum(int(wm.size) * 4 for wm in wwts)
        per_chan = 2 * h * w * esz + 2 * out_elems * esz + 8 * h * w
        tc, ncp = _choose_channel_tile(nc, per_chan, _TC_BUDGET)

        x2 = x.reshape(nc, h, w)
        if ncp != nc:
            x2 = jnp.pad(x2, ((0, ncp - nc), (0, 0), (0, 0)))

        in_specs = [pl.BlockSpec((tc, h, w), lambda i: (i, 0, 0))]
        in_specs += [pl.BlockSpec(wm.shape, lambda i: (0, 0)) for wm in wwts]
        out_specs, out_shapes = [], []
        for (ho, wo) in sizes[1:]:
            out_specs.append(pl.BlockSpec((tc, ho, wo), lambda i: (i, 0, 0)))
            out_shapes.append(jax.ShapeDtypeStruct((ncp, ho, wo), x.dtype))

        flops = 2 * ncp * sum((-(-hi // 8) * 8) * wi * wo
                              for (hi, wi), (_, wo) in zip(sizes[:-1], sizes[1:]))
        flops += 3 * ncp * out_elems
        bytes_accessed = ncp * (h * w + out_elems) * esz + weight_bytes
        kernel = functools.partial(_sep_pyramid_kernel, num_levels, sizes, taps)
        operands = (x2, *wwts)

    # Explicit VMEM budget when the working set is large (items #4/#5).
    total_est = tc * per_chan + 2 * weight_bytes
    vmem_limit = None
    if 2 * total_est > (30 << 20):
        vmem_limit = int(min(60 << 20, 2 * total_est))

    outs = pl.pallas_call(
        kernel,
        out_shape=tuple(out_shapes),
        grid=(ncp // tc,),
        in_specs=in_specs,
        out_specs=tuple(out_specs),
        compiler_params=pltpu.CompilerParams(
            dimension_semantics=("parallel",),
            vmem_limit_bytes=vmem_limit),
        cost_estimate=pl.CostEstimate(flops=int(flops), transcendentals=0,
                                      bytes_accessed=int(bytes_accessed)),
    )(*operands)

    results = [x]
    for (ho, wo), o in zip(sizes[1:], outs):
        if ncp != nc:
            o = o[:nc]
        results.append(o.reshape(n, c, ho, wo))
    return tuple(results)


class Head:
    """JAX/Pallas port of Models/SCN.py::Head.

    The module has no learnable parameters (its only submodule is a fixed
    bilinear 0.5x downsampler), so there is nothing to load from a checkpoint.
    """

    def __init__(self, n_feats: int, num_scales: int):
        self.n_feats = n_feats
        self.num_scales = num_scales
        self._fwd = jax.jit(functools.partial(_forward, num_scales=num_scales))

    def __call__(self, x: jnp.ndarray):
        return list(self._fwd(x))


if __name__ == "__main__":
    key = jax.random.PRNGKey(0)
    n, c, h, w = 2, 4, 16, 16                 # NCHW, matching PyTorch convention
    num_scales = 3
    x = jax.random.normal(key, (n, c, h, w), dtype=jnp.float32)

    head = Head(n_feats=c, num_scales=num_scales)
    outs = head(x)
    for o in outs:
        jax.block_until_ready(o)

    # expected pyramid shapes (16 -> 8 -> 4)
    expected = [(n, c, h >> s, w >> s) for s in range(num_scales)]
    assert [tuple(o.shape) for o in outs] == expected, \
        f"shape mismatch: {[o.shape for o in outs]} vs {expected}"

    # numeric check against a plain-JAX separable-bilinear reference
    ref = [x]
    cur = x.astype(jnp.float32)
    for _ in range(num_scales - 1):
        hi, wi = cur.shape[2], cur.shape[3]
        ho, wo = hi // 2, wi // 2
        wh = jnp.asarray(_bilinear_matrix_np(hi, ho))
        wwt = jnp.asarray(_bilinear_matrix_np(wi, wo)).T
        cur = jnp.einsum("oh,nchw,wk->ncok", wh, cur, wwt)
        ref.append(cur.astype(x.dtype))
    assert jnp.array_equal(outs[0], x), "level-0 output must be the input"
    for got, want in zip(outs[1:], ref[1:]):
        assert jnp.allclose(got, want, atol=1e-5, rtol=1e-5), "numeric mismatch"

    print("KERNEL_OK")
</pallas_src>

<mosaic_0001>
module attributes {stable_mosaic.version = 11 : i64} {
  func.func @_flat_pyramid_kernel(%arg0: i32, %arg1: memref<8x256xf32, #tpu.memory_space<vmem>>, %arg2: memref<256x64xf32, #tpu.memory_space<vmem>>, %arg3: memref<64x16xf32, #tpu.memory_space<vmem>>, %arg4: memref<8x64xf32, #tpu.memory_space<vmem>>, %arg5: memref<8x16xf32, #tpu.memory_space<vmem>>) attributes {dimension_semantics = [#tpu.dimension_semantics<parallel>], iteration_bounds = array<i64: 1>, scalar_prefetch = 0 : i64, scratch_operands = 0 : i64, tpu.core_type = #tpu.core_type<tc>, window_params = [{transform_indices = @transform_0, window_bounds = array<i64: 8, 256>}, {pipeline_mode = #tpu.pipeline_mode<synchronous>, transform_indices = @transform_1, window_bounds = array<i64: 256, 64>}, {pipeline_mode = #tpu.pipeline_mode<synchronous>, transform_indices = @transform_2, window_bounds = array<i64: 64, 16>}, {transform_indices = @transform_3, window_bounds = array<i64: 8, 64>}, {transform_indices = @transform_4, window_bounds = array<i64: 8, 16>}]} {
    %c0 = arith.constant 0 : index
    %c0_0 = arith.constant 0 : index
    %0 = vector.load %arg1[%c0, %c0_0] : memref<8x256xf32, #tpu.memory_space<vmem>>, vector<8x256xf32>
    %c0_1 = arith.constant 0 : index
    %c0_2 = arith.constant 0 : index
    %1 = vector.load %arg2[%c0_1, %c0_2] : memref<256x64xf32, #tpu.memory_space<vmem>>, vector<256x64xf32>
    %cst = arith.constant dense<0.000000e+00> : vector<8x64xf32>
    %2 = tpu.matmul %0, %1, %cst {dimension_numbers = #tpu.dot_dimension_numbers<[1], [0], [0], [1], [0, 0, 1, 1], [], []>} : vector<8x256xf32>, vector<256x64xf32>, vector<8x64xf32> -> vector<8x64xf32>
    %c0_3 = arith.constant 0 : index
    %c0_4 = arith.constant 0 : index
    %3 = vector.load %arg4[%c0_3, %c0_4] : memref<8x64xf32, #tpu.memory_space<vmem>>, vector<8x64xf32>
    tpu.vector_store %arg4[%c0_3, %c0_4], %2 {strides = array<i32>} : memref<8x64xf32, #tpu.memory_space<vmem>>, vector<8x64xf32>,
    %c0_5 = arith.constant 0 : index
    %c0_6 = arith.constant 0 : index
    %4 = vector.load %arg3[%c0_5, %c0_6] : memref<64x16xf32, #tpu.memory_space<vmem>>, vector<64x16xf32>
    %cst_7 = arith.constant dense<0.000000e+00> : vector<8x16xf32>
    %5 = tpu.matmul %2, %4, %cst_7 {dimension_numbers = #tpu.dot_dimension_numbers<[1], [0], [0], [1], [0, 0, 1, 1], [], []>} : vector<8x64xf32>, vector<64x16xf32>, vector<8x16xf32> -> vector<8x16xf32>
    %c0_8 = arith.constant 0 : index
    %c0_9 = arith.constant 0 : index
    %6 = vector.load %arg5[%c0_8, %c0_9] : memref<8x16xf32, #tpu.memory_space<vmem>>, vector<8x16xf32>
    tpu.vector_store %arg5[%c0_8, %c0_9], %5 {strides = array<i32>} : memref<8x16xf32, #tpu.memory_space<vmem>>, vector<8x16xf32>,
    return
  }
  func.func @transform_0(%arg0: i32) -> (i32, i32) {
    %c0_i32 = arith.constant 0 : i32
    %c0_i32_0 = arith.constant 0 : i32
    return %arg0, %c0_i32 : i32, i32
  }
  func.func @transform_1(%arg0: i32) -> (i32, i32) {
    %c0_i32 = arith.constant 0 : i32
    %c0_i32_0 = arith.constant 0 : i32
    %c0_i32_1 = arith.constant 0 : i32
    return %c0_i32, %c0_i32_0 : i32, i32
  }
  func.func @transform_2(%arg0: i32) -> (i32, i32) {
    %c0_i32 = arith.constant 0 : i32
    %c0_i32_0 = arith.constant 0 : i32
    %c0_i32_1 = arith.constant 0 : i32
    return %c0_i32, %c0_i32_0 : i32, i32
  }
  func.func @transform_3(%arg0: i32) -> (i32, i32) {
    %c0_i32 = arith.constant 0 : i32
    %c0_i32_0 = arith.constant 0 : i32
    return %arg0, %c0_i32 : i32, i32
  }
  func.func @transform_4(%arg0: i32) -> (i32, i32) {
    %c0_i32 = arith.constant 0 : i32
    %c0_i32_0 = arith.constant 0 : i32
    return %arg0, %c0_i32 : i32, i32
  }
}

</mosaic_0001>

<bundles_post_ra>
// kernel: _forward.1
= control target key start
LH: loop header
LB: loop body
LE: loop exit
PB: predicated region body
PF: predicated region fallthrough
CT: control target
= control target key end

     0   :  { %10 = vsyncpa [#allocation3], 0  ;;  %s319_s15 = smov [#allocation2]   ;;  %s397_s0 = inlined_call_operand.vmem [shape: f32[8,256], index: 0, kind: input, shape index: {}]   ;;  %s398_s1 = inlined_call_operand.hbm [shape: f32[256,64], index: 1, kind: input, shape index: {}]   ;;  %s399_s2 = inlined_call_operand.vmem [shape: f32[64,16], index: 2, kind: input, shape index: {}]   ;;  %s400_s3 = inlined_call_operand.vmem [shape: f32[8,64], index: 3, kind: output, shape index: {0}]   ;;  %s401_s4 = inlined_call_operand.vmem [shape: f32[8,16], index: 4, kind: output, shape index: {1}]  }
   0x1   :  { %s18_s16 = sshll.u32 %s319_s15, 4  ;;  %s19_s16 = int_to_ptr.vmem [resolvable:$true] %s18_s16 }
   0x2   :  { %s305_s17 = scalar_lea.vmem %s19_s16, 4096  ;;  %p310_p1 = scmp.lt.s32.totalorder %s19_s16, %s19_s16 }
   0x3   :  { %p306_p0 = scmp.ne.s32.totalorder %s19_s16, %s305_s17  ;;  %p311_p2 = scmp.lt.s32.totalorder %s305_s17, %s305_s17 }
   0x5   :  { %p312_p3 = por %p311_p2, %p310_p1 }
   0x7   :  { %p313_p4 = pnand %p312_p3, %p306_p0 }
   0x9   :  { %316 = shalt.err (!%p313_p4)
}
   0xa   :  { %s320_s18 = smov 128   ;;  %s321_s19 = smov 8  }
   0xb   :  { %24 = dma.hbm_to_vmem [thread:$0]  %s398_s1, 4096, %s19_s16, [#allocation3], %s320_s18, %s320_s18, %s321_s19  }
   0xc   :  { %317 = dma.done.wait [#allocation3], 4096  }
   0xd   :  { %318 = vsyncadd [#allocation3], 4294963200  ;;  %v322_v0 = vmov 0.0   ;;  %v63_v1 = vld [vmem:[#allocation2 + $0xf8] sm:$0xff]  ;;  %v62_v3 = vld [vmem:[#allocation2 + $0xf0] sm:$0xff]  ;;  %vm323_vm0 = vmmov 0  }
   0xe   :  { %273 = vmatprep.subr.mxu1 %v322_v0  ;;  %v47_v2 = vld [vmem:[#allocation2 + $0x78] sm:$0xff]  ;;  %229 = vmatprep.subr.mxu0 %v63_v1  ;;  %v46_v4 = vld [vmem:[#allocation2 + $0x70] sm:$0xff]  ;;  %v61_v5 = vld [vmem:[#allocation2 + $0xe8] sm:$0xff]  ;;  %vm134_vm1 = vcmask 523264   ;;  %vm217_vm2 = vcmask 130048  }
   0xf   :  { %230 = vmatpush3.msra.mxu0 %v47_v2  ;;  %v45_v6 = vld [vmem:[#allocation2 + $0x68] sm:$0xff]  ;;  %v60_v7 = vld [vmem:[#allocation2 + $0xe0] sm:$0xff]  ;;  %v59_v9 = vld [vmem:[#allocation2 + $0xd8] sm:$0xff]  ;;  %289 = vmatprep.mubr.msk.f32.mxu1 %vm323_vm0, %v322_v0 }
  0x10   :  { %231 = vmatprep.subr.mxu0 %v62_v3  ;;  %v44_v8 = vld [vmem:[#allocation2 + $0x60] sm:$0xff]  ;;  %v43_v10 = vld [vmem:[#allocation2 + $0x58] sm:$0xff]  ;;  %v58_v11 = vld [vmem:[#allocation2 + $0xd0] sm:$0xff] }
  0x11   :  { %232 = vmatpush3.msra.mxu0 %v46_v4  ;;  %v42_v12 = vld [vmem:[#allocation2 + $0x50] sm:$0xff]  ;;  %v57_v13 = vld [vmem:[#allocation2 + $0xc8] sm:$0xff]  ;;  %v143_v16 = vld [vmem:[%s399_s2 + $0x38] sm:$0xff] }
  0x12   :  { %233 = vmatprep.subr.mxu0 %v61_v5  ;;  %v31_v14 = vld [vmem:[%s397_s0 + $0x8] sm:$0xff]  ;;  %v142_v17 = vld [vmem:[%s399_s2 + $0x30] sm:$0xff]  ;;  %v56_v18 = vld [vmem:[#allocation2 + $0xc0] sm:$0xff]  ;;  %274 = vmatpush3.msra.mxu1 %v143_v16 }
  0x13   :  { %234 = vmatpush3.msra.mxu0 %v45_v6  ;;  %v41_v15 = vld [vmem:[#allocation2 + $0x48] sm:$0xff]  ;;  %128 = vmatprep.mubr.f32.mxu0 %v31_v14  ;;  %v40_v19 = vld [vmem:[#allocation2 + $0x40] sm:$0xff]  ;;  %v55_v21 = vld [vmem:[#allocation2 + $0xb8] sm:$0xff] }
  0x14   :  { %235 = vmatprep.subr.mxu0 %v60_v7  ;;  %275 = vmatprep.subr.mxu1 %v322_v0  ;;  %v141_v20 = vld [vmem:[%s399_s2 + $0x28] sm:$0xff]  ;;  %v39_v22 = vld [vmem:[#allocation2 + $0x38] sm:$0xff]  ;;  %v140_v23 = vld [vmem:[%s399_s2 + $0x20] sm:$0xff] }
  0x15   :  { %236 = vmatpush3.msra.mxu0 %v44_v8  ;;  %276 = vmatpush3.msra.mxu1 %v142_v17  ;;  %v54_v24 = vld [vmem:[#allocation2 + $0xb0] sm:$0xff]  ;;  %v139_v26 = vld [vmem:[%s399_s2 + $0x18] sm:$0xff]  ;;  %v53_v27 = vld [vmem:[#allocation2 + $0xa8] sm:$0xff] }
  0x16   :  { %237 = vmatprep.subr.mxu0 %v59_v9  ;;  %277 = vmatprep.subr.mxu1 %v322_v0  ;;  %v38_v25 = vld [vmem:[#allocation2 + $0x30] sm:$0xff]  ;;  %v37_v28 = vld [vmem:[#allocation2 + $0x28] sm:$0xff]  ;;  %v52_v29 = vld [vmem:[#allocation2 + $0xa0] sm:$0xff] }
  0x17   :  { %238 = vmatpush3.msra.mxu0 %v43_v10  ;;  %278 = vmatpush3.msra.mxu1 %v141_v20  ;;  %v36_v30 = vld [vmem:[#allocation2 + $0x20] sm:$0xff]  ;;  %v51_v31 = vld [vmem:[#allocation2 + $0x98] sm:$0xff]  ;;  %v50_v33 = vld [vmem:[#allocation2 + $0x90] sm:$0xff] }
  0x18   :  { %239 = vmatprep.subr.mxu0 %v58_v11  ;;  %279 = vmatprep.subr.mxu1 %v322_v0  ;;  %v35_v32 = vld [vmem:[#allocation2 + $0x18] sm:$0xff]  ;;  %v34_v34 = vld [vmem:[#allocation2 + $0x10] sm:$0xff]  ;;  %v49_v35 = vld [vmem:[#allocation2 + $0x88] sm:$0xff] }
  0x19   :  { %240 = vmatpush3.msra.mxu0 %v42_v12  ;;  %280 = vmatpush3.msra.mxu1 %v140_v23  ;;  %v33_v36 = vld [vmem:[#allocation2 + $0x8] sm:$0xff]  ;;  %v48_v37 = vld [vmem:[#allocation2 + $0x80] sm:$0xff]  ;;  %v138_v40 = vld [vmem:[%s399_s2 + $0x10] sm:$0xff] }
  0x1a   :  { %241 = vmatprep.subr.mxu0 %v57_v13  ;;  %281 = vmatprep.subr.mxu1 %v322_v0  ;;  %v32_v38 = vld [vmem:[#allocation2] sm:$0xff]  ;;  %v137_v41 = vld [vmem:[%s399_s2 + $0x8] sm:$0xff] }
  0x1b   :  { %242 = vmatpush3.msra.mxu0 %v41_v15  ;;  %282 = vmatpush3.msra.mxu1 %v139_v26  ;;  %v30_v39 = vld [vmem:[%s397_s0] sm:$0xff] }
  0x1c   :  { %243 = vmatprep.subr.mxu0 %v56_v18  ;;  %283 = vmatprep.subr.mxu1 %v322_v0  ;;  %v136_v42 = vld [vmem:[%s399_s2] sm:$0xff] }
  0x1d   :  { %244 = vmatpush3.msra.mxu0 %v40_v19  ;;  %284 = vmatpush3.msra.mxu1 %v138_v40 }
  0x1e   :  { %245 = vmatprep.subr.mxu0 %v55_v21  ;;  %285 = vmatprep.subr.mxu1 %v322_v0 }
  0x1f   :  { %246 = vmatpush3.msra.mxu0 %v39_v22  ;;  %286 = vmatpush3.msra.mxu1 %v137_v41 }
  0x20   :  { %247 = vmatprep.subr.mxu0 %v54_v24  ;;  %287 = vmatprep.subr.mxu1 %v322_v0 }
  0x21   :  { %248 = vmatpush3.msra.mxu0 %v38_v25  ;;  %288 = vmatpush3.msra.mxu1 %v136_v42 }
  0x22   :  { %249 = vmatprep.subr.mxu0 %v53_v27 }
  0x23   :  { %250 = vmatpush3.msra.mxu0 %v37_v28 }
  0x24   :  { %251 = vmatprep.subr.mxu0 %v52_v29 }
  0x25   :  { %252 = vmatpush3.msra.mxu0 %v36_v30 }
  0x26   :  { %253 = vmatprep.subr.mxu0 %v51_v31 }
  0x27   :  { %254 = vmatpush3.msra.mxu0 %v35_v32 }
  0x28   :  { %255 = vmatprep.subr.mxu0 %v50_v33 }
  0x29   :  { %256 = vmatpush3.msra.mxu0 %v34_v34 }
  0x2a   :  { %257 = vmatprep.subr.mxu0 %v49_v35 }
  0x2b   :  { %258 = vmatpush3.msra.mxu0 %v33_v36 }
  0x2c   :  { %259 = vmatprep.subr.mxu0 %v48_v37 }
  0x2d   :  { %260 = vmatpush3.msra.mxu0 %v32_v38 }
  0x2e   :  { %129 = vmatmul.mubr.f32.vlgmr.msra.gmra.mxu0 %v30_v39 }
  0xee   :  { %v261_v43 = vpop.f32.mrf.mxu0 }
  0xf0   :  { %v262_v44 = vpop.f32.mrf.mxu0 }
  0xf1   :  { %v263_v45 = vadd.f32 %v262_v44, %v261_v43 }
  0xf3   :  { %135 = vst.msk [vmem:[%s400_s3] sm:$0xff] %vm134_vm1, %v263_v45  ;;  %290 = vmatmul.mubr.msk.f32.vlgmr.msra.gmra.mxu1 %vm134_vm1, %v263_v45 }
 0x1b3   :  { %v213_v46 = vpop.f32.mrf.mxu1 }
 0x1b4   :  { %218 = vst.msk [vmem:[%s401_s4] sm:$0xff] %vm217_vm2, %v213_v46 }
 0x1b5   :  { %v291_v47 = vpop.f32.mrf.mxu1 }
 0x1b6   :  { %227 = vsyncpa [#allocation3], 1 }

</bundles_post_ra>
